<compile_context>
chip_gen: v7x
topology: tpu7x:2x2x1
jax: 0.10.0
libtpu: 0.0.40
codegen_flags: <defaults>
</compile_context>

<pallas_src>
import functools

import jax
import jax.numpy as jnp
from jax import lax
from jax.experimental import pallas as pl
from jax.experimental.pallas import tpu as pltpu


def _qkv_attention_kernel(x_ref, w_ref, o_ref, *, batch, seq, hidden_dim,
                          mxu_dtype, approx_recip):
    B, S, H = batch, seq, hidden_dim

    # --- Fused Q/K/V projection over all B*S rows: one MXU push, f32 acc. ---
    x = x_ref[...].astype(mxu_dtype)                      # (B*S, H)
    w = w_ref[...].astype(mxu_dtype)                      # (H, 3H); no-op cast on fast path
    qkv = jnp.dot(x, w, preferred_element_type=jnp.float32)   # (B*S, 3H) f32
    # Single cast before slicing so each Q/K/V slice doesn't pay its own cast.
    qkv = qkv.astype(mxu_dtype)

    # --- Per-batch attention, statically unrolled (B is tiny & static). ---
    for b in range(B):
        r0 = b * S
        q = qkv[r0:r0 + S, 0:H]                           # (S, H)
        k = qkv[r0:r0 + S, H:2 * H]                       # (S, H)
        v = qkv[r0:r0 + S, 2 * H:3 * H]                   # (S, H)

        # scores = Q @ K^T without materializing a transpose (contract dim 1).
        scores = lax.dot_general(
            q, k, dimension_numbers=(((1,), (1,)), ((), ())),
            preferred_element_type=jnp.float32)           # (S, S) f32

        # Row softmax (== F.softmax(..., dim=2)); kept in f32 on VPU/EUP.
        # TODO(synk): for non-toy S, replace the full (S,S) scores with a
        # KV-tiled online-softmax loop (v7x has only 64 MiB VMEM).
        scores = scores - jnp.max(scores, axis=-1, keepdims=True)
        p = jnp.exp(scores)
        denom = jnp.sum(p, axis=-1, keepdims=True)
        p = p * pl.reciprocal(denom, approx=approx_recip)

        out = jnp.dot(p.astype(mxu_dtype), v,
                      preferred_element_type=jnp.float32)     # (S, H)

        # TODO(synk): lane-dense (B, S*H) output store skipped — the
        # (S,H)->(S*H) lane-merging relayout is not guaranteed to lower at
        # these shapes; revisit if the store path shows up in profiles.
        o_ref[b] = out.astype(o_ref.dtype)


def prepare_qkv_weights(wq, wk, wv, mxu_dtype=jnp.bfloat16):
    """One-time prep (hoisted out of the per-call path): fuse PyTorch-style
    (out, in) Q/K/V weights into a single pre-transposed (H, 3H) matrix in the
    MXU dtype, so the kernel does a plain `x @ W_qkv`."""
    return jnp.concatenate([wq.T, wk.T, wv.T], axis=1).astype(mxu_dtype)


@functools.partial(jax.jit, static_argnames=("mxu_dtype", "approx_recip"))
def qkv_attention(x, w_qkv, *, mxu_dtype=jnp.bfloat16, approx_recip=True):
    """x: (B, S, H) activations.  w_qkv: (H, 3H) from `prepare_qkv_weights`."""
    B, S, H = x.shape
    assert w_qkv.shape == (H, 3 * H)

    kernel = functools.partial(
        _qkv_attention_kernel, batch=B, seq=S, hidden_dim=H,
        mxu_dtype=mxu_dtype, approx_recip=approx_recip)

    proj_flops = 2 * (B * S) * H * (3 * H)
    attn_flops = 2 * (2 * B * S * S * H)          # Q@K^T and P@V
    bytes_accessed = (x.size * x.dtype.itemsize
                      + w_qkv.size * w_qkv.dtype.itemsize
                      + B * S * H * x.dtype.itemsize)
    cost = pl.CostEstimate(flops=proj_flops + attn_flops,
                           transcendentals=B * S * S,
                           bytes_accessed=bytes_accessed)

    return pl.pallas_call(
        kernel,
        out_shape=jax.ShapeDtypeStruct((B, S, H), x.dtype),
        # Single grid step: whole arrays resident in VMEM (a few KiB total).
        in_specs=[
            pl.BlockSpec(memory_space=pltpu.MemorySpace.VMEM),   # x (B*S, H)
            pl.BlockSpec(memory_space=pltpu.MemorySpace.VMEM),   # W_qkv (H, 3H)
        ],
        out_specs=pl.BlockSpec(memory_space=pltpu.MemorySpace.VMEM),
        cost_estimate=cost,
    )(x.reshape(B * S, H), w_qkv)


def qkv_attention_ref(x, wq, wk, wv):
    """Pure-JAX reference matching the PyTorch forward exactly (f32)."""
    q = jnp.einsum("bsh,oh->bso", x, wq)
    k = jnp.einsum("bsh,oh->bso", x, wk)
    v = jnp.einsum("bsh,oh->bso", x, wv)
    alpha = jax.nn.softmax(jnp.einsum("bqh,bkh->bqk", q, k), axis=2)
    return jnp.einsum("bqk,bkh->bqh", alpha, v)


if __name__ == "__main__":
    B, S, H = 2, 8, 32   # batch=2, seq=8, hidden_dim=32

    key = jax.random.PRNGKey(0)
    kx, kq, kk, kv = jax.random.split(key, 4)

    x = jax.random.normal(kx, (B, S, H), dtype=jnp.float32)
    # Deterministic nn.Linear-style init: U(-1/sqrt(H), 1/sqrt(H)), shape (out, in)
    bound = 1.0 / (H ** 0.5)
    wq = jax.random.uniform(kq, (H, H), jnp.float32, -bound, bound)
    wk = jax.random.uniform(kk, (H, H), jnp.float32, -bound, bound)
    wv = jax.random.uniform(kv, (H, H), jnp.float32, -bound, bound)

    ref = qkv_attention_ref(x, wq, wk, wv)

    # Exact path: f32 MXU inputs + exact reciprocal -> tight tolerance.
    w_qkv_f32 = prepare_qkv_weights(wq, wk, wv, mxu_dtype=jnp.float32)
    out_exact = jax.block_until_ready(
        qkv_attention(x, w_qkv_f32, mxu_dtype=jnp.float32, approx_recip=False))
    assert out_exact.shape == (B, S, H)
    assert jnp.allclose(out_exact, ref, atol=1e-5, rtol=1e-5), \
        "exact-path mismatch vs reference"

    # Fast path (default): bf16 MXU inputs, f32 accumulation, EUP reciprocal.
    w_qkv_bf16 = prepare_qkv_weights(wq, wk, wv, mxu_dtype=jnp.bfloat16)
    out_fast = jax.block_until_ready(qkv_attention(x, w_qkv_bf16))
    assert out_fast.shape == (B, S, H)
    assert jnp.allclose(out_fast, ref, atol=2e-2, rtol=2e-2), \
        "bf16-path mismatch vs reference"

    print("KERNEL_OK")
</pallas_src>

<mosaic_0001>
module attributes {stable_mosaic.version = 11 : i64} {
  func.func @_qkv_attention_kernel(%arg0: memref<16x32xf32, #tpu.memory_space<vmem>>, %arg1: memref<32x96xf32, #tpu.memory_space<vmem>>, %arg2: memref<2x8x32xf32, #tpu.memory_space<vmem>>) attributes {dimension_semantics = [], scalar_prefetch = 0 : i64, scratch_operands = 0 : i64, tpu.core_type = #tpu.core_type<tc>} {
    %c0 = arith.constant 0 : index
    %c0_0 = arith.constant 0 : index
    %0 = vector.load %arg0[%c0, %c0_0] : memref<16x32xf32, #tpu.memory_space<vmem>>, vector<16x32xf32>
    %c0_1 = arith.constant 0 : index
    %c0_2 = arith.constant 0 : index
    %1 = vector.load %arg1[%c0_1, %c0_2] : memref<32x96xf32, #tpu.memory_space<vmem>>, vector<32x96xf32>
    %cst = arith.constant dense<0.000000e+00> : vector<16x96xf32>
    %2 = tpu.matmul %0, %1, %cst {dimension_numbers = #tpu.dot_dimension_numbers<[1], [0], [0], [1], [0, 0, 1, 1], [], []>} : vector<16x32xf32>, vector<32x96xf32>, vector<16x96xf32> -> vector<16x96xf32>
    %3 = vector.extract_strided_slice %2 {offsets = [0, 0], sizes = [8, 32], strides = [1, 1]} : vector<16x96xf32> to vector<8x32xf32>
    %4 = vector.extract_strided_slice %2 {offsets = [0, 32], sizes = [8, 32], strides = [1, 1]} : vector<16x96xf32> to vector<8x32xf32>
    %5 = vector.extract_strided_slice %2 {offsets = [0, 64], sizes = [8, 32], strides = [1, 1]} : vector<16x96xf32> to vector<8x32xf32>
    %cst_3 = arith.constant dense<0.000000e+00> : vector<8x8xf32>
    %6 = tpu.matmul %3, %4, %cst_3 {dimension_numbers = #tpu.dot_dimension_numbers<[1], [1], [0], [0], [0, 0, 1, 0], [], []>} : vector<8x32xf32>, vector<8x32xf32>, vector<8x8xf32> -> vector<8x8xf32>
    %cst_4 = arith.constant dense<0xFF800000> : vector<8xf32>
    %7 = vector.multi_reduction <maximumf>, %6, %cst_4 [1] : vector<8x8xf32> to vector<8xf32>
    %8 = vector.shape_cast %7 : vector<8xf32> to vector<8x1xf32>
    %9 = vector.broadcast %8 : vector<8x1xf32> to vector<8x8xf32>
    %10 = arith.subf %6, %9 : vector<8x8xf32>
    %11 = math.exp %10 : vector<8x8xf32>
    %cst_5 = arith.constant dense<0.000000e+00> : vector<8xf32>
    %12 = vector.multi_reduction <add>, %11, %cst_5 [1] : vector<8x8xf32> to vector<8xf32>
    %13 = vector.shape_cast %12 : vector<8xf32> to vector<8x1xf32>
    %14 = tpu.reciprocal %13 : vector<8x1xf32> -> vector<8x1xf32>
    %15 = vector.broadcast %14 : vector<8x1xf32> to vector<8x8xf32>
    %16 = arith.mulf %11, %15 : vector<8x8xf32>
    %cst_6 = arith.constant dense<0.000000e+00> : vector<8x32xf32>
    %17 = tpu.matmul %16, %5, %cst_6 {dimension_numbers = #tpu.dot_dimension_numbers<[1], [0], [0], [1], [0, 0, 1, 1], [], []>} : vector<8x8xf32>, vector<8x32xf32>, vector<8x32xf32> -> vector<8x32xf32>
    %c0_7 = arith.constant 0 : index
    %c0_8 = arith.constant 0 : index
    %c0_9 = arith.constant 0 : index
    %18 = vector.load %arg2[%c0_7, %c0_8, %c0_9] : memref<2x8x32xf32, #tpu.memory_space<vmem>>, vector<1x8x32xf32>
    %19 = vector.shape_cast %18 : vector<1x8x32xf32> to vector<8x32xf32>
    %20 = vector.shape_cast %17 : vector<8x32xf32> to vector<1x8x32xf32>
    tpu.vector_store %arg2[%c0_7, %c0_8, %c0_9], %20 {strides = array<i32>} : memref<2x8x32xf32, #tpu.memory_space<vmem>>, vector<1x8x32xf32>,
    %21 = vector.extract_strided_slice %2 {offsets = [8, 0], sizes = [8, 32], strides = [1, 1]} : vector<16x96xf32> to vector<8x32xf32>
    %22 = vector.extract_strided_slice %2 {offsets = [8, 32], sizes = [8, 32], strides = [1, 1]} : vector<16x96xf32> to vector<8x32xf32>
    %23 = vector.extract_strided_slice %2 {offsets = [8, 64], sizes = [8, 32], strides = [1, 1]} : vector<16x96xf32> to vector<8x32xf32>
    %cst_10 = arith.constant dense<0.000000e+00> : vector<8x8xf32>
    %24 = tpu.matmul %21, %22, %cst_10 {dimension_numbers = #tpu.dot_dimension_numbers<[1], [1], [0], [0], [0, 0, 1, 0], [], []>} : vector<8x32xf32>, vector<8x32xf32>, vector<8x8xf32> -> vector<8x8xf32>
    %cst_11 = arith.constant dense<0xFF800000> : vector<8xf32>
    %25 = vector.multi_reduction <maximumf>, %24, %cst_11 [1] : vector<8x8xf32> to vector<8xf32>
    %26 = vector.shape_cast %25 : vector<8xf32> to vector<8x1xf32>
    %27 = vector.broadcast %26 : vector<8x1xf32> to vector<8x8xf32>
    %28 = arith.subf %24, %27 : vector<8x8xf32>
    %29 = math.exp %28 : vector<8x8xf32>
    %cst_12 = arith.constant dense<0.000000e+00> : vector<8xf32>
    %30 = vector.multi_reduction <add>, %29, %cst_12 [1] : vector<8x8xf32> to vector<8xf32>
    %31 = vector.shape_cast %30 : vector<8xf32> to vector<8x1xf32>
    %32 = tpu.reciprocal %31 : vector<8x1xf32> -> vector<8x1xf32>
    %33 = vector.broadcast %32 : vector<8x1xf32> to vector<8x8xf32>
    %34 = arith.mulf %29, %33 : vector<8x8xf32>
    %cst_13 = arith.constant dense<0.000000e+00> : vector<8x32xf32>
    %35 = tpu.matmul %34, %23, %cst_13 {dimension_numbers = #tpu.dot_dimension_numbers<[1], [0], [0], [1], [0, 0, 1, 1], [], []>} : vector<8x8xf32>, vector<8x32xf32>, vector<8x32xf32> -> vector<8x32xf32>
    %c1 = arith.constant 1 : index
    %c0_14 = arith.constant 0 : index
    %c0_15 = arith.constant 0 : index
    %36 = vector.load %arg2[%c1, %c0_14, %c0_15] : memref<2x8x32xf32, #tpu.memory_space<vmem>>, vector<1x8x32xf32>
    %37 = vector.shape_cast %36 : vector<1x8x32xf32> to vector<8x32xf32>
    %38 = vector.shape_cast %35 : vector<8x32xf32> to vector<1x8x32xf32>
    tpu.vector_store %arg2[%c1, %c0_14, %c0_15], %38 {strides = array<i32>} : memref<2x8x32xf32, #tpu.memory_space<vmem>>, vector<1x8x32xf32>,
    return
  }
}

</mosaic_0001>

<bundles_post_ra>
// kernel: qkv_attention.1
= control target key start
LH: loop header
LB: loop body
LE: loop exit
PB: predicated region body
PF: predicated region fallthrough
CT: control target
= control target key end

     0   :  { %7 = vsyncpa [#allocation3], 0  ;;  %s715_s0 = inlined_call_operand.hbm [shape: f32[16,32], index: 0, kind: input, shape index: {}]   ;;  %s716_s1 = inlined_call_operand.hbm [shape: f32[32,96], index: 1, kind: input, shape index: {}]   ;;  %s717_s2 = inlined_call_operand.hbm [shape: f32[2,8,32], index: 2, kind: output, shape index: {}]  }
   0x1   :  { %8 = vsyncpa [#allocation6], 0 }
   0x2   :  { %9 = vsyncpa [#allocation4], 0  ;;  %s628_s9 = smov [#allocation2]   ;;  %s556_s13 = scalar_lea.hbm %s715_s0, 256 }
   0x3   :  { %s15_s10 = sshll.u32 %s628_s9, 4  ;;  %p557_p0 = scmp.ne.s32.totalorder %s715_s0, %s556_s13  ;;  %s16_s10 = int_to_ptr.vmem [resolvable:$true] %s15_s10 }
   0x4   :  { %p560_p1 = scmp.lt.u32.totalorder %s556_s13, %s715_s0 }
   0x6   :  { %p562_p2 = pnand %p560_p1, %p557_p0 }
   0x8   :  { %565 = shalt.err (!%p562_p2)
}
   0x9   :  { %s566_s18 = scalar_lea.vmem %s16_s10, 256  ;;  %p571_p4 = scmp.lt.s32.totalorder %s16_s10, %s16_s10 }
   0xa   :  { %p567_p3 = scmp.ne.s32.totalorder %s16_s10, %s566_s18  ;;  %p572_p5 = scmp.lt.s32.totalorder %s566_s18, %s566_s18 }
   0xc   :  { %p573_p6 = por %p572_p5, %p571_p4 }
   0xe   :  { %p574_p7 = pnand %p573_p6, %p567_p3 }
  0x10   :  { %577 = shalt.err (!%p574_p7)
}
  0x11   :  { %s629_s19 = smov 128   ;;  %s630_s20 = smov 8  }
  0x12   :  { %21 = dma.hbm_to_vmem [thread:$0]  %s715_s0, 256, %s16_s10, [#allocation3], %s629_s19, %s629_s19, %s630_s20  }
  0x13   :  { %s631_s23 = smov [#allocation5]   ;;  %s578_s27 = scalar_lea.hbm %s716_s1, 512 }
  0x14   :  { %s27_s24 = sshll.u32 %s631_s23, 4  ;;  %p579_p8 = scmp.ne.s32.totalorder %s716_s1, %s578_s27  ;;  %s28_s24 = int_to_ptr.vmem [resolvable:$true] %s27_s24 }
  0x15   :  { %p582_p9 = scmp.lt.u32.totalorder %s578_s27, %s716_s1 }
  0x17   :  { %p584_p10 = pnand %p582_p9, %p579_p8 }
  0x19   :  { %587 = shalt.err (!%p584_p10)
}
  0x1a   :  { %s588_s4 = scalar_lea.vmem %s28_s24, 512  ;;  %p593_p12 = scmp.lt.s32.totalorder %s28_s24, %s28_s24 }
  0x1b   :  { %p589_p11 = scmp.ne.s32.totalorder %s28_s24, %s588_s4  ;;  %p594_p13 = scmp.lt.s32.totalorder %s588_s4, %s588_s4 }
  0x1d   :  { %p595_p0 = por %p594_p13, %p593_p12 }
  0x1f   :  { %p596_p1 = pnand %p595_p0, %p589_p11 }
  0x21   :  { %599 = shalt.err (!%p596_p1)
}
  0x22   :  { %33 = dma.hbm_to_vmem [thread:$0]  %s716_s1, 512, %s28_s24, [#allocation6], %s629_s19, %s629_s19, %s630_s20  }
  0x23   :  { %622 = dma.done.wait [#allocation3], 256  }
  0x24   :  { %623 = vsyncadd [#allocation3], 4294967040 }
  0x25   :  { %624 = dma.done.wait [#allocation6], 512  }
  0x26   :  { %625 = vsyncadd [#allocation6], 4294966784  ;;  %vm46_vm0 = vcmask 261120   ;;  %v42_v0 = vld [vmem:[#allocation5] sm:$0xff]  ;;  %v43_v1 = vld [vmem:[#allocation5 + $0x8] sm:$0xff]  ;;  %v632_v8 = vmov 0.0  }
  0x27   :  { %v44_v2 = vld [vmem:[#allocation5 + $0x10] sm:$0xff]  ;;  %v531_v3 = vpack.c.bf16 %v43_v1, %v42_v0  ;;  %v45_v4 = vld [vmem:[#allocation5 + $0x18] sm:$0xff]  ;;  %511 = vmatprep.subr.mxu1 %v632_v8  ;;  %vm633_vm1 = vmmov 0   ;;  %s634_s1 = smov 96   ;;  %vm205_vm2 = vcmask 64512   ;;  %s635_s6 = smov 64  }
  0x28   :  { %v40_v5 = vld [vmem:[#allocation2] sm:$0xff]  ;;  %v535_v6 = vpack.c.bf16 %v45_v4, %v44_v2  ;;  %v41_v7 = vld [vmem:[#allocation2 + $0x8] sm:$0xff]  ;;  %513 = vmatprep.mubr.msk.f32.mxu1 %vm633_vm1, %v632_v8  ;;  %s636_s7 = smov [#allocation7]  }
  0x29   :  { %508 = vmatprep.mubr.msk.f32.mxu0 %vm46_vm0, %v40_v5  ;;  %532 = vmatprep.subr.bf16.mxu0 %v531_v3  ;;  %s465_s8 = sshll.u32 %s636_s7, 4  ;;  %s466_s8 = int_to_ptr.vmem [resolvable:$true] %s465_s8 }
  0x2a   :  { %534 = vmatpush3.bf16.msra.mxu0 %v531_v3  ;;  %s600_s9 = scalar_lea.vmem %s466_s8, 256  ;;  %p605_p3 = scmp.lt.s32.totalorder %s466_s8, %s466_s8 }
  0x2b   :  { %536 = vmatprep.subr.bf16.mxu0 %v535_v6  ;;  %p601_p2 = scmp.ne.s32.totalorder %s466_s8, %s600_s9  ;;  %p606_p4 = scmp.lt.s32.totalorder %s600_s9, %s600_s9 }
  0x2d   :  { %p607_p5 = por %p606_p4, %p605_p3 }
  0x2e   :  { %538 = vmatpush3.bf16.msra.mxu0 %v535_v6 }
  0x2f   :  { %521 = vmatprep.subr.mxu0 %v632_v8  ;;  %p608_p6 = pnand %p607_p5, %p601_p2 }
  0x31   :  { %509 = vmatmul.mubr.msk.f32.vlgmr.msra.gmra.mrb[0].mxu0 %vm46_vm0, %v41_v7 }
  0x32   :  { %523 = vmatprep.mubr.msk.f32.mxu0 %vm633_vm1, %v632_v8 }
 0x104   :  { %v510_v9 = vpop.f32.mrb[0].mxu0 }
 0x105   :  { %v119_v10 = vpop.f32.mrb[1].mxu0 }
 0x106   :  { %129 = vrot.lane.b32.xlu0 %v119_v10, %s634_s1 }
 0x10a   :  { %295 = vrot.lane.b32.xlu0 %v510_v9, %s634_s1 }
 0x178   :  { %v130_v11 = vpop.permute.xlu0 %129 }
 0x179   :  { %512 = vmatpush3.xpose.msk.msra.mxu1 %vm46_vm0, %v130_v11 }
 0x17a   :  { %516 = vmatprep.subr.mxu1 %v632_v8 }
 0x17c   :  { %514 = vmatmul.mubr.msk.f32.vlgmr.msra.gmra.mrb[0].mxu1 %vm46_vm0, %v119_v10  ;;  %v296_v12 = vpop.permute.xlu0 %295 }
 0x17d   :  { %522 = vmatpush3.xpose.msk.msra.mxu0 %vm46_vm0, %v296_v12  ;;  %518 = vmatprep.mubr.msk.f32.mxu1 %vm633_vm1, %v632_v8 }
 0x180   :  { %524 = vmatmul.mubr.msk.f32.vlgmr.msra.gmra.mrb[2].mxu0 %vm46_vm0, %v510_v9 }
 0x24f   :  { %v201_v13 = vpop.f32.mrb[0].mxu1 }
 0x250   :  { %v515_v14 = vpop.f32.mrb[1].mxu1  ;;  %v206_v15 = vsel %vm205_vm2, %v201_v13, -inf }
 0x251   :  { %207 = vmax.xlane.f32.xlu1 %v206_v15 }
 0x253   :  { %v367_v16 = vpop.f32.mrb[2].mxu0 }
 0x254   :  { %v525_v17 = vpop.f32.mrb[3].mxu0  ;;  %v371_v18 = vsel %vm205_vm2, %v367_v16, -inf }
 0x255   :  { %372 = vmax.xlane.f32.xlu1 %v371_v18 }
 0x2de   :  { %v208_v19 = vpop.xlane.xlu1 %207 }
 0x2df   :  { %v209_v20 = vsub.f32 %v201_v13, %v208_v19 }
 0x2e1   :  { %v210_v21 = vmul.f32 1.442695, %v209_v20 }
 0x2e2   :  { %v373_v22 = vpop.xlane.xlu1 %372 }
 0x2e3   :  { %548 = vpow2.f32 %v210_v21  ;;  %v374_v23 = vsub.f32 %v367_v16, %v373_v22 }
 0x2e5   :  { %v375_v24 = vmul.f32 1.442695, %v374_v23 }
 0x2e7   :  { %550 = vpow2.f32 %v375_v24 }
 0x2ed   :  { %v549_v25 = vpop.eup %548 }
 0x2ee   :  { %v212_v26 = vsel %vm205_vm2, %v549_v25, 0.0 }
 0x2ef   :  { %213 = vadd.xlane.f32.xlu0 %v212_v26 }
 0x2f1   :  { %v551_v27 = vpop.eup %550 }
 0x2f2   :  { %v377_v28 = vsel %vm205_vm2, %v551_v27, 0.0 }
 0x2f3   :  { %378 = vadd.xlane.f32.xlu1 %v377_v28 }
 0x304   :  { %217 = vrot.lane.b32.xlu1 %v119_v10, %s635_s6 }
 0x308   :  { %382 = vrot.lane.b32.xlu1 %v510_v9, %s635_s6 }
 0x37c   :  { %v214_v29 = vpop.xlane.xlu0 %213 }
 0x37d   :  { %552 = vrcp.f32 %v214_v29 }
 0x380   :  { %v379_v30 = vpop.xlane.xlu1 %378 }
 0x381   :  { %554 = vrcp.f32 %v379_v30 }
 0x384   :  { %v218_v31 = vpop.permute.xlu1 %217 }
 0x385   :  { %517 = vmatpush3.msra.mxu1 %v218_v31 }
 0x386   :  { %526 = vmatprep.subr.mxu1 %v632_v8 }
 0x387   :  { %v553_v32 = vpop.eup %552 }
 0x388   :  { %v216_v33 = vmul.f32 %v553_v32, %v549_v25  ;;  %v383_v34 = vpop.permute.xlu1 %382 }
 0x38a   :  { %519 = vmatmul.mubr.msk.f32.vlgmr.msra.gmra.mrb[2].mxu1 %vm205_vm2, %v216_v33 }
 0x38b   :  { %v555_v35 = vpop.eup %554  ;;  %527 = vmatpush3.msra.mxu1 %v383_v34  ;;  %528 = vmatprep.mubr.msk.f32.mxu1 %vm633_vm1, %v632_v8 }
 0x38c   :  { %v381_v36 = vmul.f32 %v555_v35, %v551_v27 }
 0x38e   :  { %529 = vmatmul.mubr.msk.f32.vlgmr.msra.gmra.mrb[4].mxu1 %vm205_vm2, %v381_v36 }
 0x45d   :  { %v289_v37 = vpop.f32.mrb[2].mxu1 }
 0x45e   :  { %293 = vst.msk [vmem:[#allocation7] sm:$0xff] %vm46_vm0, %v289_v37  ;;  %v520_v38 = vpop.f32.mrb[3].mxu1 }
 0x461   :  { %v454_v39 = vpop.f32.mrb[4].mxu1 }
 0x462   :  { %459 = vst.msk [vmem:[#allocation7 + $0x8] sm:$0xff] %vm46_vm0, %v454_v39  ;;  %v530_v40 = vpop.f32.mrb[5].mxu1 }
 0x463   :  { %611 = shalt.err (!%p608_p6)
}
 0x464   :  { %s612_s12 = scalar_lea.hbm %s717_s2, 256 }
 0x465   :  { %p613_p7 = scmp.ne.s32.totalorder %s717_s2, %s612_s12  ;;  %p616_p8 = scmp.lt.u32.totalorder %s612_s12, %s717_s2 }
 0x467   :  { %p618_p9 = pnand %p616_p8, %p613_p7 }
 0x469   :  { %621 = shalt.err (!%p618_p9)
}
 0x46a   :  { %471 = dma.vmem_to_hbm [thread:$0]  %s466_s8, 256, %s717_s2, [#allocation4], %s629_s19, %s629_s19, %s630_s20  }
 0x46b   :  { %626 = dma.done.wait [#allocation4], 256  }
 0x46c   :  { %627 = vsyncadd [#allocation4], 4294967040 }
 0x46d   :  { %475 = vsyncpa [#allocation3], 1 }
 0x46e   :  { %476 = vsyncpa [#allocation6], 1 }
 0x46f   :  { %477 = vsyncpa [#allocation4], 1 }

</bundles_post_ra>
